<compile_context>
chip_gen: v6e
topology: v6e:2x2x1
jax: 0.10.0
libtpu: 0.0.40
codegen_flags: <defaults>
</compile_context>

<pallas_src>
import jax
import jax.numpy as jnp
from jax.experimental import pallas as pl
from jax.experimental.pallas import tpu as pltpu


def sca_kernel(x_ref, wt_ref, b_ref, o_ref):
    """One batch tile of SCA.

    x_ref : (Bt, Cp, HW)  input tile (input dtype)
    wt_ref: (Cp, Cp)      transposed 1x1-conv weight (W^T), f32
    b_ref : (1, Cp)       bias, f32
    o_ref : (Bt, Cp, HW)  output tile (input dtype)
    """
    x = x_ref[...]                                            # single load, input dtype

    # Global average pool over the spatial (lane) axis, accumulated in f32.
    pooled = jnp.mean(x.astype(jnp.float32), axis=-1)         # (Bt, Cp)

    # 1x1 conv == channel-mixing matmul, batched over the whole tile: one MXU issue
    # per block instead of a per-sample (C,C)x(C,1) matvec on the critical path.
    y = jnp.dot(pooled, wt_ref[...], preferred_element_type=jnp.float32)
    y = jax.nn.sigmoid(y + b_ref[...])                        # (Bt, Cp), f32

    # Dominant (memory-bound) pass: broadcast multiply + single store to o_ref,
    # kept in the input dtype; only the tiny (Bt, Cp, 1) scale is cast.
    o_ref[...] = x * y[:, :, None].astype(x.dtype)


def _sublanes_for(dtype):
    # f32 -> 8 sublanes per vreg, bf16 -> 16, int8/fp8 -> 32.
    return max(8, 32 // jnp.dtype(dtype).itemsize)


def _pick_pack_factor(B, C, dtype):
    """How many batches to fold into the channel (sublane) axis."""
    sub = _sublanes_for(dtype)
    if C >= sub or sub % C != 0:
        return 1
    p = sub // C
    while p > 1 and B % p != 0:
        p -= 1
    return p


def _pick_batch_tile(B_eff, per_sample_bytes, target_bytes=4 << 20, min_steps=2):
    """Largest batch tile that divides B_eff, stays near target_bytes per block
    (double-buffered in+out blocks then fit comfortably inside v7x's 64 MiB VMEM),
    and keeps >= min_steps grid steps for megacore sharding when possible."""
    bt = max(1, target_bytes // max(1, per_sample_bytes))
    if B_eff >= min_steps:
        bt = min(bt, B_eff // min_steps)
    bt = max(1, min(bt, B_eff))
    while B_eff % bt:
        bt -= 1
    return bt


def sca_forward(x_nchw, weight, bias):
    """x_nchw: (B, C, H, W); weight: (C, C, 1, 1); bias: (C,). Returns (B, C, H, W)."""
    B, C, H, W = x_nchw.shape
    HW = H * W
    in_dtype = x_nchw.dtype

    # --- Sublane packing: fold p batches into the channel axis so small C does not
    # waste vreg sublanes on the bandwidth-dominant elementwise pass.
    p = _pick_pack_factor(B, C, in_dtype)
    B_eff, Cp = B // p, C * p

    x_flat = x_nchw.reshape(B_eff, Cp, HW)        # HW on lanes (full-width -> lane-dense)

    w2d = weight.reshape(C, C).astype(jnp.float32)
    b1d = bias.astype(jnp.float32)
    if p > 1:
        # Block-diagonal weight / tiled bias act independently on each packed sample.
        w2d = jnp.kron(jnp.eye(p, dtype=jnp.float32), w2d)    # (Cp, Cp)
        b1d = jnp.tile(b1d, p)                                 # (Cp,)
    wt = w2d.T                                    # kernel computes pooled @ W^T
    b2d = b1d.reshape(1, Cp)

    # --- Batch tile: big blocks amortize per-grid-step overhead.
    per_sample_bytes = Cp * HW * jnp.dtype(in_dtype).itemsize
    Bt = _pick_batch_tile(B_eff, per_sample_bytes)

    out_flat = pl.pallas_call(
        sca_kernel,
        out_shape=jax.ShapeDtypeStruct((B_eff, Cp, HW), in_dtype),
        grid_spec=pltpu.PrefetchScalarGridSpec(
            num_scalar_prefetch=0,
            grid=(B_eff // Bt,),
            in_specs=[
                pl.BlockSpec((Bt, Cp, HW), lambda b: (b, 0, 0)),
                pl.BlockSpec((Cp, Cp), lambda b: (0, 0)),
                pl.BlockSpec((1, Cp), lambda b: (0, 0)),
            ],
            out_specs=pl.BlockSpec((Bt, Cp, HW), lambda b: (b, 0, 0)),
        ),
        compiler_params=pltpu.CompilerParams(
            dimension_semantics=("parallel",),
            # Raised above the 16/32 MiB scoped defaults, but <= v7x's 64 MiB physical;
            # double-buffered in+out blocks stay well under half of this.
            vmem_limit_bytes=48 * 1024 * 1024,
        ),
    )(x_flat, wt, b2d)

    return out_flat.reshape(B, C, H, W)


def sca_reference(x_nchw, weight, bias):
    """Pure-JAX reference mirroring the PyTorch forward."""
    _, C, _, _ = x_nchw.shape
    y = jnp.mean(x_nchw, axis=(2, 3), keepdims=True)              # (B, C, 1, 1)
    y = jnp.einsum('oc,bcij->boij', weight.reshape(C, C), y) + bias.reshape(1, C, 1, 1)
    return x_nchw * jax.nn.sigmoid(y)


if __name__ == "__main__":
    B, C, H, W = 2, 4, 16, 16

    key = jax.random.PRNGKey(0)
    kx, kw, kb = jax.random.split(key, 3)

    x = jax.random.normal(kx, (B, C, H, W), dtype=jnp.float32)
    # Deterministic synthetic parameters (Conv2d(C, C, kernel_size=1, bias=True) shapes).
    weight = jax.random.normal(kw, (C, C, 1, 1), dtype=jnp.float32) * 0.1
    bias = jax.random.normal(kb, (C,), dtype=jnp.float32) * 0.1

    out = jax.block_until_ready(sca_forward(x, weight, bias))
    ref = sca_reference(x, weight, bias)

    assert out.shape == (B, C, H, W)
    assert jnp.allclose(out, ref, atol=1e-5, rtol=1e-5), "mismatch vs reference"

    print("KERNEL_OK")
</pallas_src>

<mosaic_0001>
module attributes {stable_mosaic.version = 11 : i64} {
  func.func @sca_kernel(%arg0: i32, %arg1: memref<1x8x256xf32, #tpu.memory_space<vmem>>, %arg2: memref<8x8xf32, #tpu.memory_space<vmem>>, %arg3: memref<1x8xf32, #tpu.memory_space<vmem>>, %arg4: memref<1x8x256xf32, #tpu.memory_space<vmem>>) attributes {dimension_semantics = [#tpu.dimension_semantics<parallel>], iteration_bounds = array<i64: 1>, scalar_prefetch = 0 : i64, scratch_operands = 0 : i64, tpu.core_type = #tpu.core_type<tc>, window_params = [{transform_indices = @transform_0, window_bounds = array<i64: 1, 8, 256>}, {pipeline_mode = #tpu.pipeline_mode<synchronous>, transform_indices = @transform_1, window_bounds = array<i64: 8, 8>}, {pipeline_mode = #tpu.pipeline_mode<synchronous>, transform_indices = @transform_2, window_bounds = array<i64: 1, 8>}, {transform_indices = @transform_3, window_bounds = array<i64: 1, 8, 256>}]} {
    %c0 = arith.constant 0 : index
    %c0_0 = arith.constant 0 : index
    %c0_1 = arith.constant 0 : index
    %0 = vector.load %arg1[%c0, %c0_0, %c0_1] : memref<1x8x256xf32, #tpu.memory_space<vmem>>, vector<1x8x256xf32>
    %cst = arith.constant dense<0.000000e+00> : vector<1x8xf32>
    %1 = vector.multi_reduction <add>, %0, %cst [2] : vector<1x8x256xf32> to vector<1x8xf32>
    %cst_2 = arith.constant 2.560000e+02 : f32
    %2 = vector.broadcast %cst_2 : f32 to vector<1x8xf32>
    %3 = arith.divf %1, %2 : vector<1x8xf32>
    %c0_3 = arith.constant 0 : index
    %c0_4 = arith.constant 0 : index
    %4 = vector.load %arg2[%c0_3, %c0_4] : memref<8x8xf32, #tpu.memory_space<vmem>>, vector<8x8xf32>
    %cst_5 = arith.constant dense<0.000000e+00> : vector<1x8xf32>
    %5 = tpu.matmul %3, %4, %cst_5 {dimension_numbers = #tpu.dot_dimension_numbers<[1], [0], [0], [1], [0, 0, 1, 1], [], []>} : vector<1x8xf32>, vector<8x8xf32>, vector<1x8xf32> -> vector<1x8xf32>
    %c0_6 = arith.constant 0 : index
    %c0_7 = arith.constant 0 : index
    %6 = vector.load %arg3[%c0_6, %c0_7] : memref<1x8xf32, #tpu.memory_space<vmem>>, vector<1x8xf32>
    %7 = arith.addf %5, %6 : vector<1x8xf32>
    %8 = arith.negf %7 : vector<1x8xf32>
    %9 = math.exp %8 : vector<1x8xf32>
    %cst_8 = arith.constant 1.000000e+00 : f32
    %10 = vector.broadcast %cst_8 : f32 to vector<1x8xf32>
    %11 = arith.addf %10, %9 : vector<1x8xf32>
    %12 = arith.divf %10, %11 : vector<1x8xf32>
    %13 = vector.shape_cast %12 : vector<1x8xf32> to vector<1x8x1xf32>
    %14 = vector.broadcast %13 : vector<1x8x1xf32> to vector<1x8x256xf32>
    %15 = arith.mulf %0, %14 : vector<1x8x256xf32>
    %c0_9 = arith.constant 0 : index
    %c0_10 = arith.constant 0 : index
    %c0_11 = arith.constant 0 : index
    %16 = vector.load %arg4[%c0_9, %c0_10, %c0_11] : memref<1x8x256xf32, #tpu.memory_space<vmem>>, vector<1x8x256xf32>
    tpu.vector_store %arg4[%c0_9, %c0_10, %c0_11], %15 {strides = array<i32>} : memref<1x8x256xf32, #tpu.memory_space<vmem>>, vector<1x8x256xf32>,
    return
  }
  func.func @transform_0(%arg0: i32) -> (i32, i32, i32) {
    %c0_i32 = arith.constant 0 : i32
    %c0_i32_0 = arith.constant 0 : i32
    %c0_i32_1 = arith.constant 0 : i32
    return %arg0, %c0_i32, %c0_i32_0 : i32, i32, i32
  }
  func.func @transform_1(%arg0: i32) -> (i32, i32) {
    %c0_i32 = arith.constant 0 : i32
    %c0_i32_0 = arith.constant 0 : i32
    %c0_i32_1 = arith.constant 0 : i32
    return %c0_i32, %c0_i32_0 : i32, i32
  }
  func.func @transform_2(%arg0: i32) -> (i32, i32) {
    %c0_i32 = arith.constant 0 : i32
    %c0_i32_0 = arith.constant 0 : i32
    %c0_i32_1 = arith.constant 0 : i32
    return %c0_i32, %c0_i32_0 : i32, i32
  }
  func.func @transform_3(%arg0: i32) -> (i32, i32, i32) {
    %c0_i32 = arith.constant 0 : i32
    %c0_i32_0 = arith.constant 0 : i32
    %c0_i32_1 = arith.constant 0 : i32
    return %arg0, %c0_i32, %c0_i32_0 : i32, i32, i32
  }
}

</mosaic_0001>

<bundles_post_ra>
// kernel: tpu_custom_call.1
= control target key start
LH: loop header
LB: loop body
LE: loop exit
PB: predicated region body
PF: predicated region fallthrough
CT: control target
= control target key end

     0   :  { %8 = vsyncpa [#allocation3], 0  ;;  %s282_s0 = inlined_call_operand.hbm [shape: f32[1,8,256], index: 0, kind: input, shape index: {}]   ;;  %s283_s1 = inlined_call_operand.hbm [shape: f32[8,8], index: 1, kind: input, shape index: {}]   ;;  %s284_s2 = inlined_call_operand.vmem [shape: f32[1,8], index: 2, kind: input, shape index: {}]   ;;  %s285_s3 = inlined_call_operand.hbm [shape: f32[1,8,256], index: 3, kind: output, shape index: {}]  }
   0x1   :  { %9 = vsyncpa [#allocation6], 0 }
   0x2   :  { %10 = vsyncpa [#allocation4], 0  ;;  %s245_s12 = smov [#allocation2]   ;;  %s246_s14 = smov [#allocation5]  }
   0x3   :  { %s17_s13 = sshll.u32 %s245_s12, 4  ;;  %s27_s15 = sshll.u32 %s246_s14, 4  ;;  %s18_s13 = int_to_ptr.vmem [resolvable:$true] %s17_s13  ;;  %s28_s15 = int_to_ptr.vmem [resolvable:$true] %s27_s15 }
   0x4   :  { %s187_s16 = scalar_lea.vmem %s18_s13, 256  ;;  %p192_p1 = scmp.lt.s32.totalorder %s18_s13, %s18_s13 }
   0x5   :  { %p188_p0 = scmp.ne.s32.totalorder %s18_s13, %s187_s16  ;;  %p193_p2 = scmp.lt.s32.totalorder %s187_s16, %s187_s16 }
   0x7   :  { %p194_p3 = por %p193_p2, %p192_p1 }
   0x9   :  { %p195_p4 = pnand %p194_p3, %p188_p0 }
   0xb   :  { %198 = shalt.err (!%p195_p4)
}
   0xc   :  { %20 = dma.hbm_to_vmem [thread:$0]  %s282_s0, 256, %s18_s13, [#allocation3]  }
   0xd   :  { %s207_s19 = scalar_lea.vmem %s28_s15, 128  ;;  %p212_p6 = scmp.lt.s32.totalorder %s28_s15, %s28_s15 }
   0xe   :  { %p208_p5 = scmp.ne.s32.totalorder %s28_s15, %s207_s19  ;;  %p213_p7 = scmp.lt.s32.totalorder %s207_s19, %s207_s19 }
  0x10   :  { %p214_p8 = por %p213_p7, %p212_p6 }
  0x12   :  { %p215_p9 = pnand %p214_p8, %p208_p5 }
  0x14   :  { %218 = shalt.err (!%p215_p9)
}
  0x15   :  { %30 = dma.hbm_to_vmem [thread:$0]  %s283_s1, 128, %s28_s15, [#allocation6]  }
  0x16   :  { %239 = dma.done.wait [#allocation3], 256  }
  0x17   :  { %240 = vsyncadd [#allocation3], 4294967040 }
  0x18   :  { %241 = dma.done.wait [#allocation6], 128  }
  0x19   :  { %242 = vsyncadd [#allocation6], 4294967168  ;;  %v39_v0 = vld [vmem:[#allocation2] sm:$0xff]  ;;  %v40_v1 = vld [vmem:[#allocation2 + $0x8] sm:$0xff]  ;;  %v247_v3 = vmov 0.0   ;;  %vm248_vm0 = vmmov 0   ;;  %v49_v5 = vlaneseq }
  0x1a   :  { %v41_v2 = vadd.f32 %v40_v1, %v39_v0  ;;  %165 = vmatprep.subr.mxu0 %v247_v3  ;;  %v46_v4 = vld [vmem:[#allocation5] sm:$0xff]  ;;  %167 = vmatprep.mubr.msk.f32.mxu0 %vm248_vm0, %v247_v3  ;;  %vm55_vm1 = vcmask 64512   ;;  %v47_v12 = vld [vmem:[%s284_s2] sm:$0x1]  ;;  %s249_s22 = smov [#allocation7]  }
  0x1b   :  { %166 = vmatpush3.msra.mxu0 %v46_v4  ;;  %v50_v6 = vand.u32 127, %v49_v5  ;;  %v52_v7 = vshrl.u32 %v49_v5, 7  ;;  %s151_s23 = sshll.u32 %s249_s22, 4  ;;  %s152_s23 = int_to_ptr.vmem [resolvable:$true] %s151_s23 }
  0x1c   :  { %42 = vadd.xlane.f32.xlu0 %v41_v2  ;;  %s219_s2 = scalar_lea.vmem %s152_s23, 256  ;;  %p224_p11 = scmp.lt.s32.totalorder %s152_s23, %s152_s23 }
  0x1d   :  { %v53_v8 = vsub.s32 %v50_v6, %v52_v7  ;;  %v136_v19 = vsub.s32 0, %v52_v7  ;;  %p220_p10 = scmp.ne.s32.totalorder %s152_s23, %s219_s2  ;;  %p225_p12 = scmp.lt.s32.totalorder %s219_s2, %s219_s2 }
  0x1f   :  { %p226_p13 = por %p225_p12, %p224_p11 }
  0x21   :  { %p227_p0 = pnand %p226_p13, %p220_p10 }
  0xa5   :  { %v43_v9 = vpop.xlane.xlu0 %42 }
  0xa6   :  { %v45_v10 = vmul.f32 0.00390625, %v43_v9 }
  0xa8   :  { %v54_v11 = vrot.slane %v45_v10, %v53_v8 }
  0xaa   :  { %168 = vmatmul.mubr.msk.f32.vlgmr.msra.gmra.mxu0 %vm55_vm1, %v54_v11 }
 0x16a   :  { %v124_v13 = vpop.f32.mrf.mxu0 }
 0x16b   :  { %v125_v14 = vadd.f32 %v124_v13, %v47_v12 }
 0x16c   :  { %v169_v15 = vpop.f32.mrf.mxu0 }
 0x16d   :  { %v162_v16 = vmul.f32 -1.442695, %v125_v14 }
 0x16f   :  { %175 = vpow2.f32 %v162_v16 }
 0x17c   :  { %v176_v17 = vpop.eup %175 }
 0x17d   :  { %v131_v18 = vadd.f32 1.0, %v176_v17 }
 0x17f   :  { %177 = vrcp.f32 %v131_v18 }
 0x18c   :  { %v178_v20 = vpop.eup %177 }
 0x18d   :  { %v137_v21 = vrot.slane %v178_v20, %v136_v19 }
 0x18f   :  { %139 = vbcast.lane.b32.xlu0 %v137_v21, 256 }
 0x201   :  { %v140_v22 = vpop.permute.xlu0 %139 }
 0x202   :  { %v141_v23 = vmul.f32 %v140_v22, %v39_v0  ;;  %v142_v24 = vmul.f32 %v140_v22, %v40_v1 }
 0x204   :  { %143 = vst [vmem:[#allocation7] sm:$0xff] %v141_v23  ;;  %144 = vst [vmem:[#allocation7 + $0x8] sm:$0xff] %v142_v24 }
 0x205   :  { %230 = shalt.err (!%p227_p0)
}
 0x206   :  { %154 = dma.vmem_to_hbm [thread:$0]  %s152_s23, 256, %s285_s3, [#allocation4]  }
 0x207   :  { %243 = dma.done.wait [#allocation4], 256  }
 0x208   :  { %244 = vsyncadd [#allocation4], 4294967040 }
 0x209   :  { %158 = vsyncpa [#allocation3], 1 }
 0x20a   :  { %159 = vsyncpa [#allocation6], 1 }
 0x20b   :  { %160 = vsyncpa [#allocation4], 1 }

</bundles_post_ra>
